<compile_context>
chip_gen: v6e
topology: v6e:2x2x1
jax: 0.10.0
libtpu: 0.0.40
codegen_flags: <defaults>
</compile_context>

<pallas_src>
import functools

import jax
import jax.numpy as jnp
from jax.experimental import pallas as pl
from jax.experimental.pallas import tpu as pltpu


def _round_up(v, m):
    return (v + m - 1) // m * m


def _maybe_pad(a, target_shape):
    """Zero-pad up to target_shape; no-op (no extra HBM copy) if already aligned."""
    pads = tuple((0, t - s) for s, t in zip(a.shape, target_shape))
    if all(hi == 0 for _, hi in pads):
        return a
    return jnp.pad(a, pads)


@functools.lru_cache(maxsize=None)
def _vmem_budget_bytes():
    """Usable VMEM budget: physical capacity minus headroom, generation-aware."""
    try:
        cap = int(pltpu.get_tpu_info().vmem_capacity_bytes)
    except Exception:
        cap = 64 * 1024 * 1024
    # 128 MiB chips (v5e/v6e) -> ~96 MiB usable, 64 MiB chips (v7x) -> ~48 MiB.
    return max(min(int(0.75 * cap), cap - 16 * 1024 * 1024), 32 * 1024 * 1024)


# ---------------------------------------------------------------------------
# Kernels
# ---------------------------------------------------------------------------
def _ffn_resident_kernel(x_ref, w1_ref, b1_ref, w2_ref, b2_ref, o_ref):
    # 1-D grid over M tiles; W1/W2/biases are VMEM-resident across the grid.
    h = jnp.dot(x_ref[...], w1_ref[...], preferred_element_type=jnp.float32)
    h = jnp.maximum(h + b1_ref[...].astype(jnp.float32), 0.0)
    y = jnp.dot(h.astype(w2_ref.dtype), w2_ref[...],
                preferred_element_type=jnp.float32)
    o_ref[...] = (y + b2_ref[...].astype(jnp.float32)).astype(o_ref.dtype)


def _ffn_streaming_kernel(x_ref, w1_ref, b1_ref, w2_ref, b2_ref, o_ref, acc_ref):
    # 2-D grid (M tiles, hidden tiles); weights stream over the hidden axis,
    # the f32 accumulator stays resident across it.
    j = pl.program_id(1)

    @pl.when(j == 0)
    def _():
        acc_ref[...] = jnp.zeros_like(acc_ref)

    h = jnp.dot(x_ref[...], w1_ref[...], preferred_element_type=jnp.float32)
    h = jnp.maximum(h + b1_ref[...].astype(jnp.float32), 0.0)
    acc_ref[...] += jnp.dot(h.astype(w2_ref.dtype), w2_ref[...],
                            preferred_element_type=jnp.float32)

    @pl.when(j == pl.num_programs(1) - 1)
    def _():
        o_ref[...] = (acc_ref[...]
                      + b2_ref[...].astype(jnp.float32)).astype(o_ref.dtype)


# ---------------------------------------------------------------------------
# Wrapper
# ---------------------------------------------------------------------------
@functools.partial(jax.jit,
                   static_argnames=("tm", "tn", "resident", "vmem_limit"))
def _feed_forward_impl(x, w1, b1, w2, b2, *, tm, tn, resident, vmem_limit):
    B, T, n_embd = x.shape
    hidden = w1.shape[1]
    M = B * T

    n_pad = _round_up(n_embd, 128)
    h_pad = _round_up(hidden, 128) if resident else _round_up(hidden, tn)
    m_pad = _round_up(M, tm)
    num_m_tiles = m_pad // tm

    x_bytes = jnp.dtype(x.dtype).itemsize
    w_bytes = jnp.dtype(w1.dtype).itemsize

    xp = _maybe_pad(x.reshape(M, n_embd), (m_pad, n_pad))
    w1p = _maybe_pad(w1, (n_pad, h_pad))
    b1p = _maybe_pad(b1.reshape(1, hidden), (1, h_pad))
    w2p = _maybe_pad(w2, (h_pad, n_pad))
    b2p = _maybe_pad(b2.reshape(1, n_embd), (1, n_pad))

    weight_bytes_total = (w1.size + w2.size + b1.size + b2.size) * w_bytes
    cost = pl.CostEstimate(
        flops=4 * M * n_embd * hidden,            # two matmuls, 2 flops / MAC
        transcendentals=0,
        bytes_accessed=(2 * M * n_embd * x_bytes
                        + (1 if resident else num_m_tiles) * weight_bytes_total))

    if resident:
        out2d = pl.pallas_call(
            _ffn_resident_kernel,
            out_shape=jax.ShapeDtypeStruct((m_pad, n_pad), x.dtype),
            grid_spec=pltpu.PrefetchScalarGridSpec(
                num_scalar_prefetch=0,
                grid=(num_m_tiles,),
                in_specs=[
                    pl.BlockSpec((tm, n_pad), lambda i: (i, 0)),      # x rows
                    pl.BlockSpec((n_pad, h_pad), lambda i: (0, 0)),   # W1 resident
                    pl.BlockSpec((1, h_pad), lambda i: (0, 0)),       # b1
                    pl.BlockSpec((h_pad, n_pad), lambda i: (0, 0)),   # W2 resident
                    pl.BlockSpec((1, n_pad), lambda i: (0, 0)),       # b2
                ],
                out_specs=pl.BlockSpec((tm, n_pad), lambda i: (i, 0)),
            ),
            compiler_params=pltpu.CompilerParams(
                dimension_semantics=("parallel",),
                vmem_limit_bytes=vmem_limit),
            cost_estimate=cost,
        )(xp, w1p, b1p, w2p, b2p)
    else:
        out2d = pl.pallas_call(
            _ffn_streaming_kernel,
            out_shape=jax.ShapeDtypeStruct((m_pad, n_pad), x.dtype),
            grid_spec=pltpu.PrefetchScalarGridSpec(
                num_scalar_prefetch=0,
                grid=(num_m_tiles, h_pad // tn),
                in_specs=[
                    pl.BlockSpec((tm, n_pad), lambda i, j: (i, 0)),    # x rows
                    pl.BlockSpec((n_pad, tn), lambda i, j: (0, j)),    # W1 streams
                    pl.BlockSpec((1, tn), lambda i, j: (0, j)),        # b1
                    pl.BlockSpec((tn, n_pad), lambda i, j: (j, 0)),    # W2 streams
                    pl.BlockSpec((1, n_pad), lambda i, j: (0, 0)),     # b2 invariant
                ],
                out_specs=pl.BlockSpec((tm, n_pad), lambda i, j: (i, 0)),
                scratch_shapes=[pltpu.VMEM((tm, n_pad), jnp.float32)],
            ),
            compiler_params=pltpu.CompilerParams(
                dimension_semantics=("parallel", "arbitrary"),
                vmem_limit_bytes=vmem_limit),
            cost_estimate=cost,
        )(xp, w1p, b1p, w2p, b2p)

    if m_pad != M or n_pad != n_embd:
        out2d = out2d[:M, :n_embd]
    return out2d.reshape(B, T, n_embd)


def feed_forward(x, w1, b1, w2, b2, *, block_m=512, block_h=1024,
                 weights_resident=None):
    """Eval-mode FeedForward.

    x: (B, T, n_embd). w1: (n_embd, 4n), b1: (1, 4n), w2: (4n, n_embd),
    b2: (1, n_embd) -- (in, out) layout. weights_resident: None (auto) / bool.
    """
    B, T, n_embd = x.shape
    hidden = w1.shape[1]
    M = B * T

    x_bytes = jnp.dtype(x.dtype).itemsize
    w_bytes = jnp.dtype(w1.dtype).itemsize
    row_align = 16 if x_bytes < 4 else 8   # bf16 packs 16 sublanes per vreg
    budget = _vmem_budget_bytes()

    n_pad = _round_up(n_embd, 128)
    h_pad_res = _round_up(hidden, 128)

    # --- M tiling: big tiles for arithmetic intensity, but keep >= 2 tiles so
    # the "parallel" axis can shard across both TensorCores on v7x. ---
    tm = min(block_m, _round_up(M, row_align))
    if _round_up(M, tm) // tm < 2 and M > row_align:
        tm = _round_up(pl.cdiv(_round_up(M, row_align), 2), row_align)

    # --- Hidden tiling (streaming path only). ---
    tn = min(block_h, _round_up(hidden, 128))

    # Conservative VMEM footprint for the weights-resident path (inputs/outputs
    # counted double-buffered; includes the f32 intermediate + its cast copy).
    resident_est = (
        2 * tm * n_pad * (x_bytes + x_bytes)                   # x + out tiles
        + 2 * (2 * n_pad * h_pad_res + h_pad_res + n_pad) * w_bytes  # W1,W2,b1,b2
        + tm * h_pad_res * (4 + w_bytes)                       # f32 h + cast copy
        + tm * n_pad * 4                                       # f32 2nd-matmul result
    )

    resident = (resident_est <= budget) if weights_resident is None \
        else bool(weights_resident)

    if resident:
        vmem_limit = min(max(int(1.25 * resident_est) + (4 << 20), 32 << 20), budget)
    else:
        def streaming_est(tm_, tn_):
            return (2 * tm_ * n_pad * (x_bytes + x_bytes)              # x + out
                    + 2 * (n_pad * tn_ + tn_ * n_pad + tn_ + n_pad) * w_bytes
                    + tm_ * n_pad * 4                                  # acc scratch
                    + tm_ * tn_ * (4 + w_bytes))                       # h + cast
        # Shrink the hidden tile if the streaming working set overflows budget.
        while streaming_est(tm, tn) > budget and tn > 128:
            tn = _round_up(tn // 2, 128)
        vmem_limit = min(max(int(1.25 * streaming_est(tm, tn)) + (4 << 20), 32 << 20),
                         budget)

    return _feed_forward_impl(x, w1, b1, w2, b2, tm=tm, tn=tn,
                              resident=resident, vmem_limit=vmem_limit)


def init_params(key, n_embd, dtype=jnp.float32):
    """Deterministic init mirroring nn.Linear's U(-1/sqrt(fan_in), 1/sqrt(fan_in))."""
    hidden = 4 * n_embd
    k1, k2, k3, k4 = jax.random.split(key, 4)
    bound1 = 1.0 / jnp.sqrt(n_embd)
    bound2 = 1.0 / jnp.sqrt(hidden)
    w1 = jax.random.uniform(k1, (n_embd, hidden), jnp.float32, -bound1, bound1).astype(dtype)
    b1 = jax.random.uniform(k2, (1, hidden), jnp.float32, -bound1, bound1).astype(dtype)
    w2 = jax.random.uniform(k3, (hidden, n_embd), jnp.float32, -bound2, bound2).astype(dtype)
    b2 = jax.random.uniform(k4, (1, n_embd), jnp.float32, -bound2, bound2).astype(dtype)
    return w1, b1, w2, b2


if __name__ == "__main__":
    key = jax.random.PRNGKey(0)
    kx, kp, kx2, kp2 = jax.random.split(key, 4)

    # --- small f32 check (weights-resident path, 2 M tiles) ---
    B, T, n_embd = 2, 8, 32          # hidden = 4*n_embd = 128
    x = jax.random.normal(kx, (B, T, n_embd), jnp.float32)
    w1, b1, w2, b2 = init_params(kp, n_embd)

    out = jax.block_until_ready(feed_forward(x, w1, b1, w2, b2))
    ref = (jnp.maximum(x.reshape(-1, n_embd) @ w1 + b1, 0.0) @ w2 + b2)
    ref = ref.reshape(B, T, n_embd)
    assert out.shape == (B, T, n_embd)
    assert jnp.allclose(out, ref, atol=1e-5, rtol=1e-5)

    # --- larger bf16 check: weights-resident fast path (auto) ---
    B2, T2, n_embd2 = 2, 256, 256    # hidden = 1024, M = 512 -> 2 M tiles
    x2 = jax.random.normal(kx2, (B2, T2, n_embd2), jnp.float32).astype(jnp.bfloat16)
    w1b, b1b, w2b, b2b = init_params(kp2, n_embd2, dtype=jnp.bfloat16)

    x2f = x2.reshape(-1, n_embd2)
    h_ref = jnp.maximum(jnp.dot(x2f, w1b, preferred_element_type=jnp.float32)
                        + b1b.astype(jnp.float32), 0.0)
    ref2 = (jnp.dot(h_ref.astype(jnp.bfloat16), w2b, preferred_element_type=jnp.float32)
            + b2b.astype(jnp.float32)).reshape(B2, T2, n_embd2)

    out2 = jax.block_until_ready(feed_forward(x2, w1b, b1b, w2b, b2b))
    assert out2.shape == (B2, T2, n_embd2)
    assert jnp.allclose(out2.astype(jnp.float32), ref2, atol=2e-2, rtol=2e-2)

    # --- same inputs through the streaming path (forced), multi-tile hidden axis ---
    out3 = jax.block_until_ready(
        feed_forward(x2, w1b, b1b, w2b, b2b, block_h=256, weights_resident=False))
    assert out3.shape == (B2, T2, n_embd2)
    assert jnp.allclose(out3.astype(jnp.float32), ref2, atol=2e-2, rtol=2e-2)

    print("KERNEL_OK")
</pallas_src>

<mosaic_0001>
module attributes {stable_mosaic.version = 11 : i64} {
  func.func @_ffn_resident_kernel(%arg0: i32, %arg1: memref<8x128xf32, #tpu.memory_space<vmem>>, %arg2: memref<128x128xf32, #tpu.memory_space<vmem>>, %arg3: memref<1x128xf32, #tpu.memory_space<vmem>>, %arg4: memref<128x128xf32, #tpu.memory_space<vmem>>, %arg5: memref<1x128xf32, #tpu.memory_space<vmem>>, %arg6: memref<8x128xf32, #tpu.memory_space<vmem>>) attributes {dimension_semantics = [#tpu.dimension_semantics<parallel>], iteration_bounds = array<i64: 2>, scalar_prefetch = 0 : i64, scratch_operands = 0 : i64, tpu.core_type = #tpu.core_type<tc>, window_params = [{transform_indices = @transform_0, window_bounds = array<i64: 8, 128>}, {pipeline_mode = #tpu.pipeline_mode<synchronous>, transform_indices = @transform_1, window_bounds = array<i64: 128, 128>}, {pipeline_mode = #tpu.pipeline_mode<synchronous>, transform_indices = @transform_2, window_bounds = array<i64: 1, 128>}, {pipeline_mode = #tpu.pipeline_mode<synchronous>, transform_indices = @transform_3, window_bounds = array<i64: 128, 128>}, {pipeline_mode = #tpu.pipeline_mode<synchronous>, transform_indices = @transform_4, window_bounds = array<i64: 1, 128>}, {transform_indices = @transform_5, window_bounds = array<i64: 8, 128>}]} {
    %c0 = arith.constant 0 : index
    %c0_0 = arith.constant 0 : index
    %0 = vector.load %arg1[%c0, %c0_0] : memref<8x128xf32, #tpu.memory_space<vmem>>, vector<8x128xf32>
    %c0_1 = arith.constant 0 : index
    %c0_2 = arith.constant 0 : index
    %1 = vector.load %arg2[%c0_1, %c0_2] : memref<128x128xf32, #tpu.memory_space<vmem>>, vector<128x128xf32>
    %cst = arith.constant dense<0.000000e+00> : vector<8x128xf32>
    %2 = tpu.matmul %0, %1, %cst {dimension_numbers = #tpu.dot_dimension_numbers<[1], [0], [0], [1], [0, 0, 1, 1], [], []>} : vector<8x128xf32>, vector<128x128xf32>, vector<8x128xf32> -> vector<8x128xf32>
    %c0_3 = arith.constant 0 : index
    %c0_4 = arith.constant 0 : index
    %3 = vector.load %arg3[%c0_3, %c0_4] : memref<1x128xf32, #tpu.memory_space<vmem>>, vector<1x128xf32>
    %4 = vector.broadcast %3 : vector<1x128xf32> to vector<8x128xf32>
    %5 = arith.addf %2, %4 : vector<8x128xf32>
    %cst_5 = arith.constant 0.000000e+00 : f32
    %6 = vector.broadcast %cst_5 : f32 to vector<8x128xf32>
    %7 = arith.maximumf %5, %6 : vector<8x128xf32>
    %c0_6 = arith.constant 0 : index
    %c0_7 = arith.constant 0 : index
    %8 = vector.load %arg4[%c0_6, %c0_7] : memref<128x128xf32, #tpu.memory_space<vmem>>, vector<128x128xf32>
    %cst_8 = arith.constant dense<0.000000e+00> : vector<8x128xf32>
    %9 = tpu.matmul %7, %8, %cst_8 {dimension_numbers = #tpu.dot_dimension_numbers<[1], [0], [0], [1], [0, 0, 1, 1], [], []>} : vector<8x128xf32>, vector<128x128xf32>, vector<8x128xf32> -> vector<8x128xf32>
    %c0_9 = arith.constant 0 : index
    %c0_10 = arith.constant 0 : index
    %10 = vector.load %arg5[%c0_9, %c0_10] : memref<1x128xf32, #tpu.memory_space<vmem>>, vector<1x128xf32>
    %11 = vector.broadcast %10 : vector<1x128xf32> to vector<8x128xf32>
    %12 = arith.addf %9, %11 : vector<8x128xf32>
    %c0_11 = arith.constant 0 : index
    %c0_12 = arith.constant 0 : index
    %13 = vector.load %arg6[%c0_11, %c0_12] : memref<8x128xf32, #tpu.memory_space<vmem>>, vector<8x128xf32>
    tpu.vector_store %arg6[%c0_11, %c0_12], %12 {strides = array<i32>} : memref<8x128xf32, #tpu.memory_space<vmem>>, vector<8x128xf32>,
    return
  }
  func.func @transform_0(%arg0: i32) -> (i32, i32) {
    %c0_i32 = arith.constant 0 : i32
    %c0_i32_0 = arith.constant 0 : i32
    return %arg0, %c0_i32 : i32, i32
  }
  func.func @transform_1(%arg0: i32) -> (i32, i32) {
    %c0_i32 = arith.constant 0 : i32
    %c0_i32_0 = arith.constant 0 : i32
    %c0_i32_1 = arith.constant 0 : i32
    return %c0_i32, %c0_i32_0 : i32, i32
  }
  func.func @transform_2(%arg0: i32) -> (i32, i32) {
    %c0_i32 = arith.constant 0 : i32
    %c0_i32_0 = arith.constant 0 : i32
    %c0_i32_1 = arith.constant 0 : i32
    return %c0_i32, %c0_i32_0 : i32, i32
  }
  func.func @transform_3(%arg0: i32) -> (i32, i32) {
    %c0_i32 = arith.constant 0 : i32
    %c0_i32_0 = arith.constant 0 : i32
    %c0_i32_1 = arith.constant 0 : i32
    return %c0_i32, %c0_i32_0 : i32, i32
  }
  func.func @transform_4(%arg0: i32) -> (i32, i32) {
    %c0_i32 = arith.constant 0 : i32
    %c0_i32_0 = arith.constant 0 : i32
    %c0_i32_1 = arith.constant 0 : i32
    return %c0_i32, %c0_i32_0 : i32, i32
  }
  func.func @transform_5(%arg0: i32) -> (i32, i32) {
    %c0_i32 = arith.constant 0 : i32
    %c0_i32_0 = arith.constant 0 : i32
    return %arg0, %c0_i32 : i32, i32
  }
}

</mosaic_0001>

<bundles_post_ra>
// kernel: _feed_forward_impl.1
= control target key start
LH: loop header
LB: loop body
LE: loop exit
PB: predicated region body
PF: predicated region fallthrough
CT: control target
= control target key end

     0   :  { %s627_s18 = smov 0   ;;  %s791_s0 = inlined_call_operand.vmem [shape: f32[16,128], index: 0, kind: input, shape index: {}]   ;;  %s792_s1 = inlined_call_operand.vmem [shape: f32[128,128], index: 1, kind: input, shape index: {}]   ;;  %s793_s2 = inlined_call_operand.vmem [shape: f32[1,128], index: 2, kind: input, shape index: {}]   ;;  %s794_s3 = inlined_call_operand.vmem [shape: f32[128,128], index: 3, kind: input, shape index: {}]   ;;  %s795_s4 = inlined_call_operand.vmem [shape: f32[1,128], index: 4, kind: input, shape index: {}]   ;;  %s796_s5 = inlined_call_operand.vmem [shape: f32[16,128], index: 5, kind: output, shape index: {}]  }
   0x1 LB: > { %s462_s19 = sadd.s32 4294967295, %s593_s18   ;;  %p466_p0 = scmp.ge.s32.totalorder %s593_s18, 1  ;;  %s593_s18 = sphi %s627_s18, %s15_s18  }
   0x2   : > { %p186_p1 = scmp.lt.s32.totalorder %s593_s18, 3 }
   0x4   : > { %p187_p2 = pnand %p466_p0, %p186_p1 }
   0x5   : > { %p212_p3 = scmp.lt.s32.totalorder (!%p187_p2), %s462_s19, 1 }
   0x6   : > { %190 = sbr.rel (%p187_p2) target bundleno = 437 (0x1b5), region = 40 }
   0xb   : > { %v236_v0 = vld [vmem:[%s792_s1 + $0x78] sm:$0xff]  ;;  %v595_v1 = vmov 0.0   ;;  %v235_v2 = vld [vmem:[%s792_s1 + $0x70] sm:$0xff]  ;;  %vm596_vm0 = vmmov 0   ;;  %v234_v3 = vld [vmem:[%s792_s1 + $0x68] sm:$0xff]  ;;  %s798_s19 = smov (!%p212_p3, %s462_s19), 1 }
   0xc   : > { %507 = vmatprep.subr.mxu0 %v595_v1  ;;  %539 = vmatprep.mubr.msk.f32.mxu0 %vm596_vm0, %v595_v1  ;;  %v233_v4 = vld [vmem:[%s792_s1 + $0x60] sm:$0xff]  ;;  %v330_v5 = vld [vmem:[%s794_s3 + $0x78] sm:$0xff]  ;;  %v329_v6 = vld [vmem:[%s794_s3 + $0x70] sm:$0xff]  ;;  %s467_s22 = sshll.u32 %s798_s19, 3 }
   0xd   : > { %508 = vmatpush3.msra.mxu0 %v236_v0  ;;  %542 = vmatprep.subr.mxu1 %v595_v1  ;;  %v232_v7 = vld [vmem:[%s792_s1 + $0x58] sm:$0xff]  ;;  %v328_v8 = vld [vmem:[%s794_s3 + $0x68] sm:$0xff]  ;;  %v231_v9 = vld [vmem:[%s792_s1 + $0x50] sm:$0xff]  ;;  %s215_s6 = scalar_lea.vmem %s791_s0, %s467_s22  ;;  %s219_s26 = scalar_lea.vmem %s796_s5, %s467_s22 }
   0xe   : > { %509 = vmatprep.subr.mxu0 %v595_v1  ;;  %574 = vmatprep.mubr.msk.f32.mxu1 %vm596_vm0, %v595_v1  ;;  %v327_v10 = vld [vmem:[%s794_s3 + $0x60] sm:$0xff]  ;;  %v230_v11 = vld [vmem:[%s792_s1 + $0x48] sm:$0xff]  ;;  %v326_v12 = vld [vmem:[%s794_s3 + $0x58] sm:$0xff] }
   0xf   : > { %510 = vmatpush3.msra.mxu0 %v235_v2  ;;  %543 = vmatpush3.msra.mxu1 %v330_v5  ;;  %v229_v13 = vld [vmem:[%s792_s1 + $0x40] sm:$0xff]  ;;  %v325_v14 = vld [vmem:[%s794_s3 + $0x50] sm:$0xff]  ;;  %v228_v15 = vld [vmem:[%s792_s1 + $0x38] sm:$0xff] }
  0x10   : > { %511 = vmatprep.subr.mxu0 %v595_v1  ;;  %544 = vmatprep.subr.mxu1 %v595_v1  ;;  %v324_v16 = vld [vmem:[%s794_s3 + $0x48] sm:$0xff]  ;;  %v227_v17 = vld [vmem:[%s792_s1 + $0x30] sm:$0xff]  ;;  %v323_v18 = vld [vmem:[%s794_s3 + $0x40] sm:$0xff] }
  0x11   : > { %512 = vmatpush3.msra.mxu0 %v234_v3  ;;  %545 = vmatpush3.msra.mxu1 %v329_v6  ;;  %v226_v19 = vld [vmem:[%s792_s1 + $0x28] sm:$0xff]  ;;  %v322_v20 = vld [vmem:[%s794_s3 + $0x38] sm:$0xff]  ;;  %v225_v21 = vld [vmem:[%s792_s1 + $0x20] sm:$0xff] }
  0x12   : > { %513 = vmatprep.subr.mxu0 %v595_v1  ;;  %546 = vmatprep.subr.mxu1 %v595_v1  ;;  %v321_v22 = vld [vmem:[%s794_s3 + $0x30] sm:$0xff]  ;;  %v224_v23 = vld [vmem:[%s792_s1 + $0x18] sm:$0xff]  ;;  %v320_v24 = vld [vmem:[%s794_s3 + $0x28] sm:$0xff] }
  0x13   : > { %514 = vmatpush3.msra.mxu0 %v233_v4  ;;  %547 = vmatpush3.msra.mxu1 %v328_v8  ;;  %v223_v25 = vld [vmem:[%s792_s1 + $0x10] sm:$0xff]  ;;  %v319_v26 = vld [vmem:[%s794_s3 + $0x20] sm:$0xff]  ;;  %v222_v27 = vld [vmem:[%s792_s1 + $0x8] sm:$0xff] }
  0x14   : > { %515 = vmatprep.subr.mxu0 %v595_v1  ;;  %548 = vmatprep.subr.mxu1 %v595_v1  ;;  %v318_v28 = vld [vmem:[%s794_s3 + $0x18] sm:$0xff]  ;;  %v221_v29 = vld [vmem:[%s792_s1] sm:$0xff]  ;;  %v317_v31 = vld [vmem:[%s794_s3 + $0x10] sm:$0xff] }
  0x15   : > { %516 = vmatpush3.msra.mxu0 %v232_v7  ;;  %549 = vmatpush3.msra.mxu1 %v327_v10  ;;  %v220_v30 = vld [vmem:[%s215_s6] sm:$0xff]  ;;  %v316_v32 = vld [vmem:[%s794_s3 + $0x8] sm:$0xff] }
  0x16   : > { %517 = vmatprep.subr.mxu0 %v595_v1  ;;  %550 = vmatprep.subr.mxu1 %v595_v1  ;;  %v315_v33 = vld [vmem:[%s794_s3] sm:$0xff] }
  0x17   : > { %518 = vmatpush3.msra.mxu0 %v231_v9  ;;  %551 = vmatpush3.msra.mxu1 %v326_v12  ;;  %v469_v34 = vld [vmem:[%s793_s2] ss:$0 sm:$0xff] }
  0x18   : > { %519 = vmatprep.subr.mxu0 %v595_v1  ;;  %552 = vmatprep.subr.mxu1 %v595_v1  ;;  %v470_v39 = vld [vmem:[%s795_s4] ss:$0 sm:$0xff] }
  0x19   : > { %520 = vmatpush3.msra.mxu0 %v230_v11  ;;  %553 = vmatpush3.msra.mxu1 %v325_v14 }
  0x1a   : > { %521 = vmatprep.subr.mxu0 %v595_v1  ;;  %554 = vmatprep.subr.mxu1 %v595_v1 }
  0x1b   : > { %522 = vmatpush3.msra.mxu0 %v229_v13  ;;  %555 = vmatpush3.msra.mxu1 %v324_v16 }
  0x1c   : > { %523 = vmatprep.subr.mxu0 %v595_v1  ;;  %556 = vmatprep.subr.mxu1 %v595_v1 }
  0x1d   : > { %524 = vmatpush3.msra.mxu0 %v228_v15  ;;  %557 = vmatpush3.msra.mxu1 %v323_v18 }
  0x1e   : > { %525 = vmatprep.subr.mxu0 %v595_v1  ;;  %558 = vmatprep.subr.mxu1 %v595_v1 }
  0x1f   : > { %526 = vmatpush3.msra.mxu0 %v227_v17  ;;  %559 = vmatpush3.msra.mxu1 %v322_v20 }
  0x20   : > { %527 = vmatprep.subr.mxu0 %v595_v1  ;;  %560 = vmatprep.subr.mxu1 %v595_v1 }
  0x21   : > { %528 = vmatpush3.msra.mxu0 %v226_v19  ;;  %561 = vmatpush3.msra.mxu1 %v321_v22 }
  0x22   : > { %529 = vmatprep.subr.mxu0 %v595_v1  ;;  %562 = vmatprep.subr.mxu1 %v595_v1 }
  0x23   : > { %530 = vmatpush3.msra.mxu0 %v225_v21  ;;  %563 = vmatpush3.msra.mxu1 %v320_v24 }
  0x24   : > { %531 = vmatprep.subr.mxu0 %v595_v1  ;;  %564 = vmatprep.subr.mxu1 %v595_v1 }
  0x25   : > { %532 = vmatpush3.msra.mxu0 %v224_v23  ;;  %565 = vmatpush3.msra.mxu1 %v319_v26 }
  0x26   : > { %533 = vmatprep.subr.mxu0 %v595_v1  ;;  %566 = vmatprep.subr.mxu1 %v595_v1 }
  0x27   : > { %534 = vmatpush3.msra.mxu0 %v223_v25  ;;  %567 = vmatpush3.msra.mxu1 %v318_v28 }
  0x28   : > { %535 = vmatprep.subr.mxu0 %v595_v1  ;;  %568 = vmatprep.subr.mxu1 %v595_v1 }
  0x29   : > { %536 = vmatpush3.msra.mxu0 %v222_v27  ;;  %569 = vmatpush3.msra.mxu1 %v317_v31 }
  0x2a   : > { %537 = vmatprep.subr.mxu0 %v595_v1  ;;  %570 = vmatprep.subr.mxu1 %v595_v1 }
  0x2b   : > { %538 = vmatpush3.msra.mxu0 %v221_v29  ;;  %571 = vmatpush3.msra.mxu1 %v316_v32 }
  0x2c   : > { %540 = vmatmul.mubr.f32.vlgmr.msra.gmra.mxu0 %v220_v30  ;;  %572 = vmatprep.subr.mxu1 %v595_v1 }
  0x2d   : > { %573 = vmatpush3.msra.mxu1 %v315_v33 }
  0xec   : > { %v310_v35 = vpop.f32.mrf.mxu0 }
  0xed   : > { %v311_v36 = vadd.f32 %v469_v34, %v310_v35 }
  0xee   : > { %v541_v37 = vpop.f32.mrf.mxu0 }
  0xef   : > { %v314_v38 = vmax.f32 %v311_v36, 0.0 }
  0xf1   : > { %575 = vmatmul.mubr.f32.vlgmr.msra.gmra.mxu1 %v314_v38 }
 0x1b1   : > { %v404_v40 = vpop.f32.mrf.mxu1 }
 0x1b2   : > { %v405_v41 = vadd.f32 %v470_v39, %v404_v40 }
 0x1b3   : > { %v576_v42 = vpop.f32.mrf.mxu1 }
 0x1b4   : > { %408 = vst [vmem:[%s219_s26] sm:$0xff] %v405_v41 }
 0x1b5 PF: > { %s15_s18 = sadd.s32 1, %s593_s18  }
 0x1b6   : > { %p12_p4 = scmp.ge.s32.totalorder %s15_s18, 4  }
 0x1b8   :  { %14 = sbr.rel (!%p12_p4) target bundleno = 1 (0x1), region = 70 }

</bundles_post_ra>
